<compile_context>
chip_gen: v7x
topology: tpu7x:2x2x1
jax: 0.10.0
libtpu: 0.0.40
codegen_flags: <defaults>
</compile_context>

<pallas_src>
import functools

import jax
import jax.numpy as jnp
from jax.experimental import pallas as pl
from jax.experimental.pallas import tpu as pltpu


# --------------------------------------------------------------------------
# Kernel
# --------------------------------------------------------------------------
def _actor_critic_fused_kernel(x_ref, w1_ref, b1_ref, w2_ref, b2_ref, out_ref,
                               *, num_actions):
    x = x_ref[...]                                                   # (TB, D) f32

    # Layer 1 (both heads at once): (TB, D) @ (D, 2H) + (1, 2H) -> ReLU.
    h1 = jnp.dot(x, w1_ref[...], preferred_element_type=jnp.float32)
    h1 = jnp.maximum(h1 + b1_ref[...], 0.0)                          # (TB, 2H)

    # Layer 2 (block-structured, lane-dense): (TB, 2H) @ (2H, OUT_PAD).
    # Lanes 0..A-1 = actor logits, lane A = critic value, rest = 0.
    h2 = jnp.dot(h1, w2_ref[...], preferred_element_type=jnp.float32)
    h2 = h2 + b2_ref[...]                                            # (TB, OUT_PAD)

    tb, out_pad = h2.shape
    lane = jax.lax.broadcasted_iota(jnp.int32, (tb, out_pad), 1)
    is_logit = lane < num_actions

    # Numerically-stable masked softmax over the logit lanes only.
    neg_big = jnp.float32(-1e30)
    masked_logits = jnp.where(is_logit, h2, neg_big)
    m = jnp.max(masked_logits, axis=-1, keepdims=True)               # (TB, 1)
    e = jnp.exp(masked_logits - m)                                   # pad lanes -> 0
    denom = jnp.sum(e, axis=-1, keepdims=True)                       # (TB, 1)

    # EUP approximate reciprocal + one Newton-Raphson refinement (cheap VPU).
    r = pl.reciprocal(denom, approx=True)
    r = r * (2.0 - denom * r)
    probs = e * r                                                    # (TB, OUT_PAD)

    # Lane A carries the critic value; everything past A is exactly zero.
    out_ref[...] = jnp.where(lane == num_actions, h2, probs)


# --------------------------------------------------------------------------
# Parameter packing (done once, outside the kernel)
# --------------------------------------------------------------------------
def pack_params(params, out_pad):
    """Packs per-head weights into the fused (W1, b1, W2, b2) layout."""
    (wc1, bc1, wc2, bc2, wa1, ba1, wa2, ba2) = params
    D, H = wc1.shape
    A = wa2.shape[1]
    assert out_pad >= A + 1

    # Layer 1: concat along output features -> (D, 2H), (1, 2H).
    w1 = jnp.concatenate([wc1, wa1], axis=1)
    b1 = jnp.concatenate([bc1, ba1], axis=1)

    # Layer 2: block-structured (2H, OUT_PAD).
    w2 = jnp.zeros((2 * H, out_pad), jnp.float32)
    w2 = w2.at[H:, :A].set(wa2)          # actor hidden -> logit lanes 0..A-1
    w2 = w2.at[:H, A].set(wc2[:, 0])     # critic hidden -> value lane A
    b2 = jnp.zeros((1, out_pad), jnp.float32)
    b2 = b2.at[:, :A].set(ba2)
    b2 = b2.at[:, A].set(bc2[:, 0])
    return w1, b1, w2, b2


# --------------------------------------------------------------------------
# Wrapper
# --------------------------------------------------------------------------
def actor_critic_forward(x, params, *, block_b=512):
    """Fused actor-critic forward pass. Returns (probs (B,A), value (B,1))."""
    (_, _, _, _, _, _, wa2, _) = params
    B, D = x.shape
    A = wa2.shape[1]
    OUT_PAD = 128 * pl.cdiv(A + 1, 128)            # lane-dense output width

    w1, b1, w2, b2 = pack_params(params, OUT_PAD)

    # Batch tile: as large as possible, sublane-aligned (multiple of 8) when B>=8.
    TB = min(block_b, B)
    if B >= 8:
        TB = max(8, (TB // 8) * 8)
    grid = (pl.cdiv(B, TB),)

    kernel = functools.partial(_actor_critic_fused_kernel, num_actions=A)

    resident = lambda shape: pl.BlockSpec(shape, lambda i: (0, 0))

    out = pl.pallas_call(
        kernel,
        out_shape=jax.ShapeDtypeStruct((B, OUT_PAD), jnp.float32),
        grid=grid,
        in_specs=[
            pl.BlockSpec((TB, D), lambda i: (i, 0)),   # x: blocked over batch
            resident(w1.shape),                        # weights stay resident
            resident(b1.shape),
            resident(w2.shape),
            resident(b2.shape),
        ],
        out_specs=pl.BlockSpec((TB, OUT_PAD), lambda i: (i, 0)),
        compiler_params=pltpu.CompilerParams(
            dimension_semantics=("parallel",),         # v7x: shard batch on 2 TCs
        ),
    )(x, w1, b1, w2, b2)

    probs = out[:, :A]
    value = out[:, A:A + 1]
    return probs, value


# --------------------------------------------------------------------------
# Init + pure-JAX reference
# --------------------------------------------------------------------------
def init_params(key, num_inputs, num_actions, hidden_size):
    """Deterministic synthetic init (Kaiming-uniform-ish scale like nn.Linear)."""
    ks = jax.random.split(key, 8)

    def linear(kw, kb, fan_in, fan_out):
        bound = 1.0 / jnp.sqrt(jnp.float32(fan_in))
        w = jax.random.uniform(kw, (fan_in, fan_out), jnp.float32, -bound, bound)
        b = jax.random.uniform(kb, (1, fan_out), jnp.float32, -bound, bound)
        return w, b

    wc1, bc1 = linear(ks[0], ks[1], num_inputs, hidden_size)
    wc2, bc2 = linear(ks[2], ks[3], hidden_size, 1)
    wa1, ba1 = linear(ks[4], ks[5], num_inputs, hidden_size)
    wa2, ba2 = linear(ks[6], ks[7], hidden_size, num_actions)
    return (wc1, bc1, wc2, bc2, wa1, ba1, wa2, ba2)


def reference_forward(x, params):
    (wc1, bc1, wc2, bc2, wa1, ba1, wa2, ba2) = params
    value = jnp.maximum(x @ wc1 + bc1, 0.0) @ wc2 + bc2
    logits = jnp.maximum(x @ wa1 + ba1, 0.0) @ wa2 + ba2
    probs = jax.nn.softmax(logits, axis=-1)
    return probs, value


# --------------------------------------------------------------------------
# Demo / self-test
# --------------------------------------------------------------------------
if __name__ == "__main__":
    B, num_inputs, num_actions, hidden_size = 8, 16, 8, 32

    key = jax.random.PRNGKey(0)
    kx, kp = jax.random.split(key)
    x = jax.random.normal(kx, (B, num_inputs), dtype=jnp.float32)
    params = init_params(kp, num_inputs, num_actions, hidden_size)

    fwd = jax.jit(actor_critic_forward)
    probs, value = fwd(x, params)
    jax.block_until_ready((probs, value))

    ref_probs, ref_value = reference_forward(x, params)
    assert probs.shape == (B, num_actions)
    assert value.shape == (B, 1)
    assert jnp.allclose(probs, ref_probs, atol=1e-5, rtol=1e-5)
    assert jnp.allclose(value, ref_value, atol=1e-5, rtol=1e-5)
    assert jnp.allclose(jnp.sum(probs, axis=-1), 1.0, atol=1e-5)

    # TODO(synk): torch.distributions.Categorical has no Pallas equivalent; the
    # kernel returns the distribution parameters (probs) plus the value.
    print("KERNEL_OK")
</pallas_src>

<mosaic_0001>
module attributes {stable_mosaic.version = 11 : i64} {
  func.func @_actor_critic_fused_kernel(%arg0: i32, %arg1: memref<8x16xf32, #tpu.memory_space<vmem>>, %arg2: memref<16x64xf32, #tpu.memory_space<vmem>>, %arg3: memref<1x64xf32, #tpu.memory_space<vmem>>, %arg4: memref<64x128xf32, #tpu.memory_space<vmem>>, %arg5: memref<1x128xf32, #tpu.memory_space<vmem>>, %arg6: memref<8x128xf32, #tpu.memory_space<vmem>>) attributes {dimension_semantics = [#tpu.dimension_semantics<parallel>], iteration_bounds = array<i64: 1>, scalar_prefetch = 0 : i64, scratch_operands = 0 : i64, tpu.core_type = #tpu.core_type<tc>, window_params = [{transform_indices = @transform_0, window_bounds = array<i64: 8, 16>}, {pipeline_mode = #tpu.pipeline_mode<synchronous>, transform_indices = @transform_1, window_bounds = array<i64: 16, 64>}, {pipeline_mode = #tpu.pipeline_mode<synchronous>, transform_indices = @transform_2, window_bounds = array<i64: 1, 64>}, {pipeline_mode = #tpu.pipeline_mode<synchronous>, transform_indices = @transform_3, window_bounds = array<i64: 64, 128>}, {pipeline_mode = #tpu.pipeline_mode<synchronous>, transform_indices = @transform_4, window_bounds = array<i64: 1, 128>}, {transform_indices = @transform_5, window_bounds = array<i64: 8, 128>}]} {
    %c0 = arith.constant 0 : index
    %c0_0 = arith.constant 0 : index
    %0 = vector.load %arg1[%c0, %c0_0] : memref<8x16xf32, #tpu.memory_space<vmem>>, vector<8x16xf32>
    %c0_1 = arith.constant 0 : index
    %c0_2 = arith.constant 0 : index
    %1 = vector.load %arg2[%c0_1, %c0_2] : memref<16x64xf32, #tpu.memory_space<vmem>>, vector<16x64xf32>
    %cst = arith.constant dense<0.000000e+00> : vector<8x64xf32>
    %2 = tpu.matmul %0, %1, %cst {dimension_numbers = #tpu.dot_dimension_numbers<[1], [0], [0], [1], [0, 0, 1, 1], [], []>} : vector<8x16xf32>, vector<16x64xf32>, vector<8x64xf32> -> vector<8x64xf32>
    %c0_3 = arith.constant 0 : index
    %c0_4 = arith.constant 0 : index
    %3 = vector.load %arg3[%c0_3, %c0_4] : memref<1x64xf32, #tpu.memory_space<vmem>>, vector<1x64xf32>
    %4 = vector.broadcast %3 : vector<1x64xf32> to vector<8x64xf32>
    %5 = arith.addf %2, %4 : vector<8x64xf32>
    %cst_5 = arith.constant 0.000000e+00 : f32
    %6 = vector.broadcast %cst_5 : f32 to vector<8x64xf32>
    %7 = arith.maximumf %5, %6 : vector<8x64xf32>
    %c0_6 = arith.constant 0 : index
    %c0_7 = arith.constant 0 : index
    %8 = vector.load %arg4[%c0_6, %c0_7] : memref<64x128xf32, #tpu.memory_space<vmem>>, vector<64x128xf32>
    %cst_8 = arith.constant dense<0.000000e+00> : vector<8x128xf32>
    %9 = tpu.matmul %7, %8, %cst_8 {dimension_numbers = #tpu.dot_dimension_numbers<[1], [0], [0], [1], [0, 0, 1, 1], [], []>} : vector<8x64xf32>, vector<64x128xf32>, vector<8x128xf32> -> vector<8x128xf32>
    %c0_9 = arith.constant 0 : index
    %c0_10 = arith.constant 0 : index
    %10 = vector.load %arg5[%c0_9, %c0_10] : memref<1x128xf32, #tpu.memory_space<vmem>>, vector<1x128xf32>
    %11 = vector.broadcast %10 : vector<1x128xf32> to vector<8x128xf32>
    %12 = arith.addf %9, %11 : vector<8x128xf32>
    %13 = tpu.iota {dimensions = array<i32: 1>} : vector<8x128xi32>
    %c8_i32 = arith.constant 8 : i32
    %14 = vector.broadcast %c8_i32 : i32 to vector<8x128xi32>
    %15 = arith.cmpi slt, %13, %14 : vector<8x128xi32>
    %cst_11 = arith.constant -1.000000e+30 : f32
    %16 = vector.broadcast %cst_11 : f32 to vector<8x128xf32>
    %17 = arith.select %15, %12, %16 : vector<8x128xi1>, vector<8x128xf32>
    %cst_12 = arith.constant dense<0xFF800000> : vector<8xf32>
    %18 = vector.multi_reduction <maximumf>, %17, %cst_12 [1] : vector<8x128xf32> to vector<8xf32>
    %19 = vector.shape_cast %18 : vector<8xf32> to vector<8x1xf32>
    %20 = vector.broadcast %19 : vector<8x1xf32> to vector<8x128xf32>
    %21 = arith.subf %17, %20 : vector<8x128xf32>
    %22 = math.exp %21 : vector<8x128xf32>
    %cst_13 = arith.constant dense<0.000000e+00> : vector<8xf32>
    %23 = vector.multi_reduction <add>, %22, %cst_13 [1] : vector<8x128xf32> to vector<8xf32>
    %24 = vector.shape_cast %23 : vector<8xf32> to vector<8x1xf32>
    %25 = tpu.reciprocal %24 {approx = true} : vector<8x1xf32> -> vector<8x1xf32>
    %26 = arith.mulf %24, %25 : vector<8x1xf32>
    %cst_14 = arith.constant 2.000000e+00 : f32
    %27 = vector.broadcast %cst_14 : f32 to vector<8x1xf32>
    %28 = arith.subf %27, %26 : vector<8x1xf32>
    %29 = arith.mulf %25, %28 : vector<8x1xf32>
    %30 = vector.broadcast %29 : vector<8x1xf32> to vector<8x128xf32>
    %31 = arith.mulf %22, %30 : vector<8x128xf32>
    %c8_i32_15 = arith.constant 8 : i32
    %32 = vector.broadcast %c8_i32_15 : i32 to vector<8x128xi32>
    %33 = arith.cmpi eq, %13, %32 : vector<8x128xi32>
    %34 = arith.select %33, %12, %31 : vector<8x128xi1>, vector<8x128xf32>
    %c0_16 = arith.constant 0 : index
    %c0_17 = arith.constant 0 : index
    %35 = vector.load %arg6[%c0_16, %c0_17] : memref<8x128xf32, #tpu.memory_space<vmem>>, vector<8x128xf32>
    tpu.vector_store %arg6[%c0_16, %c0_17], %34 {strides = array<i32>} : memref<8x128xf32, #tpu.memory_space<vmem>>, vector<8x128xf32>,
    return
  }
  func.func @transform_0(%arg0: i32) -> (i32, i32) {
    %c0_i32 = arith.constant 0 : i32
    %c0_i32_0 = arith.constant 0 : i32
    return %arg0, %c0_i32 : i32, i32
  }
  func.func @transform_1(%arg0: i32) -> (i32, i32) {
    %c0_i32 = arith.constant 0 : i32
    %c0_i32_0 = arith.constant 0 : i32
    %c0_i32_1 = arith.constant 0 : i32
    return %c0_i32, %c0_i32_0 : i32, i32
  }
  func.func @transform_2(%arg0: i32) -> (i32, i32) {
    %c0_i32 = arith.constant 0 : i32
    %c0_i32_0 = arith.constant 0 : i32
    %c0_i32_1 = arith.constant 0 : i32
    return %c0_i32, %c0_i32_0 : i32, i32
  }
  func.func @transform_3(%arg0: i32) -> (i32, i32) {
    %c0_i32 = arith.constant 0 : i32
    %c0_i32_0 = arith.constant 0 : i32
    %c0_i32_1 = arith.constant 0 : i32
    return %c0_i32, %c0_i32_0 : i32, i32
  }
  func.func @transform_4(%arg0: i32) -> (i32, i32) {
    %c0_i32 = arith.constant 0 : i32
    %c0_i32_0 = arith.constant 0 : i32
    %c0_i32_1 = arith.constant 0 : i32
    return %c0_i32, %c0_i32_0 : i32, i32
  }
  func.func @transform_5(%arg0: i32) -> (i32, i32) {
    %c0_i32 = arith.constant 0 : i32
    %c0_i32_0 = arith.constant 0 : i32
    return %arg0, %c0_i32 : i32, i32
  }
}

</mosaic_0001>

<bundles_post_ra>
// kernel: actor_critic_forward.1
= control target key start
LH: loop header
LB: loop body
LE: loop exit
PB: predicated region body
PF: predicated region fallthrough
CT: control target
= control target key end

     0   :  { %v281_v0 = vmov 0.0|0.0   ;;  %vm282_vm0 = vmmov 0   ;;  %v283_v3 = vmov 0.0   ;;  %vm30_vm1 = vcmask 130048   ;;  %s356_s1 = inlined_call_operand.vmem [shape: f32[16,64], index: 1, kind: input, shape index: {}]   ;;  %s357_s3 = inlined_call_operand.vmem [shape: f32[64,128], index: 3, kind: input, shape index: {}]   ;;  %s358_s0 = inlined_call_operand.vmem [shape: f32[8,16], index: 0, kind: input, shape index: {}]   ;;  %s359_s2 = inlined_call_operand.vmem [shape: f32[1,64], index: 2, kind: input, shape index: {}]   ;;  %s360_s4 = inlined_call_operand.vmem [shape: f32[1,128], index: 4, kind: input, shape index: {}]   ;;  %s361_s5 = inlined_call_operand.vmem [shape: f32[8,128], index: 5, kind: output, shape index: {}]  }
   0x1   :  { %259 = vmatprep.subr.bf16.mxu0 %v281_v0  ;;  %v21_v1 = vld [vmem:[%s356_s1] sm:$0xff]  ;;  %v22_v2 = vld [vmem:[%s356_s1 + $0x8] sm:$0xff]  ;;  %237 = vmatprep.mubr.msk.f32.mxu0 %vm282_vm0, %v283_v3  ;;  %v107_v7 = vld [vmem:[%s357_s3 + $0x10] sm:$0xff]  ;;  %vm120_vm2 = vcmask 523264   ;;  %v194_v23 = vlaneseq }
   0x2   :  { %v260_v4 = vpack.c.bf16 %v22_v2, %v21_v1  ;;  %262 = vmatprep.subr.bf16.mxu1 %v281_v0  ;;  %v105_v5 = vld [vmem:[%s357_s3] sm:$0xff]  ;;  %v106_v6 = vld [vmem:[%s357_s3 + $0x8] sm:$0xff]  ;;  %256 = vmatprep.mubr.msk.f32.mxu1 %vm282_vm0, %v283_v3  ;;  %v108_v9 = vld [vmem:[%s357_s3 + $0x18] sm:$0xff] }
   0x3   :  { %v263_v8 = vpack.c.bf16 %v106_v6, %v105_v5  ;;  %v20_v10 = vld [vmem:[%s358_s0] sm:$0xff]  ;;  %v266_v11 = vpack.c.bf16 %v108_v9, %v107_v7  ;;  %v110_v13 = vld [vmem:[%s357_s3 + $0x28] sm:$0xff]  ;;  %v111_v15 = vld [vmem:[%s357_s3 + $0x30] sm:$0xff]  ;;  %v195_v24 = vand.u32 127, %v194_v23 }
   0x4   :  { %261 = vmatpush3.bf16.msra.mxu0 %v260_v4  ;;  %v109_v12 = vld [vmem:[%s357_s3 + $0x20] sm:$0xff]  ;;  %v112_v16 = vld [vmem:[%s357_s3 + $0x38] sm:$0xff] }
   0x5   :  { %264 = vmatpush3.bf16.msra.mxu1 %v263_v8  ;;  %v269_v14 = vpack.c.bf16 %v110_v13, %v109_v12  ;;  %v272_v17 = vpack.c.bf16 %v112_v16, %v111_v15  ;;  %v217_v18 = vld [vmem:[%s359_s2] ss:$0 sm:$0xff]  ;;  %vm196_vm3 = vcmp.lt.s32.totalorder %v195_v24, 8  ;;  %vm210_vm4 = vcmp.eq.s32.totalorder %v195_v24, 8 }
   0x6   :  { %265 = vmatprep.subr.bf16.mxu1 %v281_v0  ;;  %v219_v25 = vld [vmem:[%s360_s4] ss:$0 sm:$0xff] }
   0x7   :  { %238 = vmatmul.mubr.msk.f32.vlgmr.msra.gmra.mrb[0].mxu0 %vm30_vm1, %v20_v10 }
   0x9   :  { %267 = vmatpush3.bf16.msra.mxu1 %v266_v11 }
   0xa   :  { %268 = vmatprep.subr.bf16.mxu1 %v281_v0 }
   0xd   :  { %270 = vmatpush3.bf16.msra.mxu1 %v269_v14 }
   0xe   :  { %271 = vmatprep.subr.bf16.mxu1 %v281_v0 }
  0x11   :  { %273 = vmatpush3.bf16.msra.mxu1 %v272_v17 }
  0xda   :  { %v100_v19 = vpop.f32.mrb[0].mxu0 }
  0xdb   :  { %v101_v20 = vadd.f32 %v217_v18, %v100_v19  ;;  %v239_v21 = vpop.f32.mrb[1].mxu0 }
  0xdd   :  { %v104_v22 = vmax.f32 %v101_v20, 0.0 }
  0xdf   :  { %257 = vmatmul.mubr.msk.f32.vlgmr.msra.gmra.mrb[0].mxu1 %vm120_vm2, %v104_v22 }
 0x1b2   :  { %v190_v26 = vpop.f32.mrb[0].mxu1 }
 0x1b3   :  { %v191_v27 = vadd.f32 %v219_v25, %v190_v26  ;;  %v258_v28 = vpop.f32.mrb[1].mxu1 }
 0x1b5   :  { %v197_v29 = vsel %vm196_vm3, %v191_v27, -1e+30 }
 0x1b6   :  { %198 = vmax.xlane.f32.xlu0 %v197_v29 }
 0x243   :  { %v199_v30 = vpop.xlane.xlu0 %198 }
 0x244   :  { %v200_v31 = vsub.f32 %v197_v29, %v199_v30 }
 0x246   :  { %v201_v32 = vmul.f32 1.442695, %v200_v31 }
 0x248   :  { %277 = vpow2.f32 %v201_v32 }
 0x252   :  { %v278_v33 = vpop.eup %277 }
 0x253   :  { %203 = vadd.xlane.f32.xlu0 %v278_v33 }
 0x2e0   :  { %v204_v34 = vpop.xlane.xlu0 %203 }
 0x2e1   :  { %279 = vrcp.f32 %v204_v34 }
 0x2eb   :  { %v280_v35 = vpop.eup %279 }
 0x2ec   :  { %v206_v36 = vmul.f32 %v280_v35, %v204_v34 }
 0x2ee   :  { %v207_v37 = vsub.f32 2.0, %v206_v36 }
 0x2f0   :  { %v208_v38 = vmul.f32 %v280_v35, %v207_v37 }
 0x2f2   :  { %v209_v39 = vmul.f32 %v278_v33, %v208_v38 }
 0x2f4   :  { %v211_v40 = vsel %vm210_vm4, %v191_v27, %v209_v39 }
 0x2f5   :  { %212 = vst [vmem:[%s361_s5] sm:$0xff] %v211_v40 }

</bundles_post_ra>
